<compile_context>
chip_gen: v7x
topology: tpu7x:2x2x1
jax: 0.10.0
libtpu: 0.0.40
codegen_flags: <defaults>
</compile_context>

<pallas_src>
import functools

import jax
import jax.numpy as jnp
import numpy as np
from jax.experimental import pallas as pl
from jax.experimental.pallas import tpu as pltpu


def _ceil_to(v, m):
    return ((v + m - 1) // m) * m


NEG_PAD = -1e30  # logit value for padded class lanes (exp() underflows to 0)


# ----------------------------------------------------------------------------
# Pallas kernel: full fused forward pass (everything fits in VMEM at this size)
# ----------------------------------------------------------------------------
def pagnn_kernel(adj_ref, adj_hat_ref, x_ref, mask_ref,
                 w1_ref, b1_ref, w2_ref, b2_ref, out_ref, *, f, fp):
    # ---- PaGNNConv ----------------------------------------------------------
    x = x_ref[...]                                    # [Np, 128] packed (see wrapper)
    x = jnp.where(jnp.isnan(x), 0.0, x)               # x[x.isnan()] = 0

    # Packed RHS in one elementwise mul:
    #   lanes [0,f)      : mask * x
    #   lane  f          : 1.0           (ones column -> row_sum)
    #   lanes [f+1,2f+1) : mask
    #   remaining lanes  : 0
    rhs = mask_ref[...] * x                           # [Np, 128]

    # Single MXU pass over adj computes all three SpMMs in disjoint lanes.
    agg = jnp.dot(adj_ref[...], rhs, preferred_element_type=jnp.float32)

    row_sum = agg[:, f:f + 1]                         # adj @ ones        [Np, 1]
    # Align den (lanes [f+1, 2f+1)) to num2's lanes [0, f) with an XLU roll.
    den = pltpu.roll(agg, shift=fp - (f + 1), axis=1)  # adj @ mask @ lanes [0,f)

    # den == 0 => num == 0 (adj >= 0, mask binary), so the guard reproduces
    # nan_to_num's 0/0 -> 0.  Lanes >= f of `ratio` are finite garbage/zero
    # and are killed by the zero rows of w1_p (wrapper invariant).
    ratio = jnp.where(den > 0.0, (row_sum * agg) / den, 0.0)

    # linear + relu (dropout p=0.0 -> identity)
    h = jnp.dot(ratio, w1_ref[...], preferred_element_type=jnp.float32)
    h = jnp.maximum(h + b1_ref[...], 0.0)             # [Np, Hp]

    # ---- GCNConv (reassociated: lin() before propagate(), like PyG) ---------
    hw2 = jnp.dot(h, w2_ref[...], preferred_element_type=jnp.float32)
    logits = jnp.dot(adj_hat_ref[...], hw2,
                     preferred_element_type=jnp.float32) + b2_ref[...]  # [Np,Cp]

    # ---- log_softmax over dim=1 (pad lanes carry -1e30 -> contribute 0) -----
    m = jnp.max(logits, axis=1, keepdims=True)
    z = logits - m
    lse = jnp.log(jnp.sum(jnp.exp(z), axis=1, keepdims=True))
    out_ref[...] = z - lse


# ----------------------------------------------------------------------------
# Wrapper: lane-dense padding + packed-RHS encoding + pallas_call + unpad.
# ----------------------------------------------------------------------------
def pagnn_forward(adj, adj_hat, mask, x, w1, b1, w2, b2):
    n, f = x.shape
    h = w1.shape[1]
    c = w2.shape[1]
    assert 2 * f + 1 <= 128, "packed RHS needs 2F+1 <= 128 lanes"
    fp = 128                         # packed feature slab width
    hp = _ceil_to(h, 128)
    cp = _ceil_to(c, 128)
    n_p = _ceil_to(n, 128)           # lane-dense node dim for adjacencies

    # Lane-dense adjacencies (pad rows & cols of the node dim to 128).
    adj_p = jnp.zeros((n_p, n_p), jnp.float32).at[:n, :n].set(adj)
    adj_hat_p = jnp.zeros((n_p, n_p), jnp.float32).at[:n, :n].set(adj_hat)

    # Packed operands: rhs = mask_p * x_p == [mask*x | 1 | mask | 0].
    x_p = jnp.zeros((n_p, fp), jnp.float32)
    x_p = x_p.at[:n, :f].set(x)
    x_p = x_p.at[:n, f].set(1.0)                   # ones column (row_sum)
    x_p = x_p.at[:n, f + 1:2 * f + 1].set(1.0)     # so mask rides at these lanes

    mask_p = jnp.zeros((n_p, fp), jnp.float32)
    mask_p = mask_p.at[:n, :f].set(mask)
    mask_p = mask_p.at[:n, f].set(1.0)
    mask_p = mask_p.at[:n, f + 1:2 * f + 1].set(mask)

    # INVARIANT: rows >= f of w1_p stay zero (kills ratio's non-feature lanes).
    w1_p = jnp.zeros((fp, hp), jnp.float32).at[:f, :h].set(w1)
    b1_p = jnp.zeros((1, hp), jnp.float32).at[:, :h].set(b1)
    w2_p = jnp.zeros((hp, cp), jnp.float32).at[:h, :c].set(w2)
    # Pad class lanes with a huge negative logit so log_softmax ignores them.
    b2_p = jnp.full((1, cp), NEG_PAD, jnp.float32).at[:, :c].set(b2)

    out_p = pl.pallas_call(
        functools.partial(pagnn_kernel, f=f, fp=fp),
        out_shape=jax.ShapeDtypeStruct((n_p, cp), jnp.float32),
        in_specs=[pl.BlockSpec(memory_space=pltpu.MemorySpace.VMEM)] * 8,
        out_specs=pl.BlockSpec(memory_space=pltpu.MemorySpace.VMEM),
    )(adj_p, adj_hat_p, x_p, mask_p, w1_p, b1_p, w2_p, b2_p)

    return out_p[:n, :c]


# ----------------------------------------------------------------------------
# Glue: graph construction / normalization / deterministic parameter init.
# ----------------------------------------------------------------------------
def build_graph(n):
    """Symmetric ring + skip edges, no duplicates, no self-loops."""
    i = np.arange(n)
    rows = np.concatenate([i, (i + 1) % n, i, (i + 3) % n])
    cols = np.concatenate([(i + 1) % n, i, (i + 3) % n, i])
    A = np.zeros((n, n), dtype=np.float32)
    A[rows, cols] = 1.0
    return jnp.asarray(A)


def sym_normalize(A):
    # deg = scatter_add(edge_weight, col)  ==  column sums
    deg = jnp.sum(A, axis=0)
    dinv = jnp.where(deg > 0, deg ** -0.5, 0.0)
    return dinv[:, None] * A * dinv[None, :]


def linear_params(key, fan_in, fan_out):
    kw, kb = jax.random.split(key)
    bound = 1.0 / np.sqrt(fan_in)
    w = jax.random.uniform(kw, (fan_in, fan_out), jnp.float32, -bound, bound)
    b = jax.random.uniform(kb, (1, fan_out), jnp.float32, -bound, bound)
    return w, b


def reference_forward(adj, adj_hat, mask, x, w1, b1, w2, b2):
    prec = jax.lax.Precision.HIGHEST
    x = jnp.where(jnp.isnan(x), 0.0, x)
    row_sum = jnp.sum(adj, axis=1, keepdims=True)
    num = row_sum * jnp.dot(adj, mask * x, precision=prec)
    den = jnp.dot(adj, mask, precision=prec)
    ratio = jnp.nan_to_num(num / den)
    h = jnp.maximum(jnp.dot(ratio, w1, precision=prec) + b1, 0.0)
    logits = jnp.dot(adj_hat, jnp.dot(h, w2, precision=prec),
                     precision=prec) + b2
    return jax.nn.log_softmax(logits, axis=1)


if __name__ == "__main__":
    N, F, H, C = 64, 16, 32, 8   # nodes, num_features, hidden_dim, num_classes

    key = jax.random.PRNGKey(0)
    kx, kmask, k1, k2 = jax.random.split(key, 4)

    # Node features with a couple of NaNs (module zeroes them out).
    x = jax.random.normal(kx, (N, F), jnp.float32)
    x = x.at[0, 0].set(jnp.nan).at[3, 5].set(jnp.nan)

    # Binary feature-observation mask (float, like the torch module).
    mask = jax.random.bernoulli(kmask, 0.7, (N, F)).astype(jnp.float32)

    # Adjacencies (dense here; sparse COO of the module densified in glue).
    A = build_graph(N)
    adj = sym_normalize(A)                       # PaGNNConv adjacency
    adj_hat = sym_normalize(A + jnp.eye(N))      # GCNConv adjacency (+ loops)

    # Deterministic parameters (synthetic init, not a checkpoint).
    w1, b1 = linear_params(k1, F, H)   # PaGNNConv.lin
    w2, b2 = linear_params(k2, H, C)   # GCNConv.lin (+ bias)

    out = pagnn_forward(adj, adj_hat, mask, x, w1, b1, w2, b2)
    out = jax.block_until_ready(out)

    ref = reference_forward(adj, adj_hat, mask, x, w1, b1, w2, b2)
    np.testing.assert_allclose(np.asarray(out), np.asarray(ref),
                               rtol=1e-5, atol=1e-5)

    print("KERNEL_OK")
</pallas_src>

<mosaic_0001>
module attributes {stable_mosaic.version = 11 : i64} {
  func.func @pagnn_kernel(%arg0: memref<128x128xf32, #tpu.memory_space<vmem>>, %arg1: memref<128x128xf32, #tpu.memory_space<vmem>>, %arg2: memref<128x128xf32, #tpu.memory_space<vmem>>, %arg3: memref<128x128xf32, #tpu.memory_space<vmem>>, %arg4: memref<128x128xf32, #tpu.memory_space<vmem>>, %arg5: memref<1x128xf32, #tpu.memory_space<vmem>>, %arg6: memref<128x128xf32, #tpu.memory_space<vmem>>, %arg7: memref<1x128xf32, #tpu.memory_space<vmem>>, %arg8: memref<128x128xf32, #tpu.memory_space<vmem>>) attributes {dimension_semantics = [], scalar_prefetch = 0 : i64, scratch_operands = 0 : i64, tpu.core_type = #tpu.core_type<tc>} {
    %c0 = arith.constant 0 : index
    %c0_0 = arith.constant 0 : index
    %0 = vector.load %arg2[%c0, %c0_0] : memref<128x128xf32, #tpu.memory_space<vmem>>, vector<128x128xf32>
    %1 = arith.cmpf one, %0, %0 : vector<128x128xf32>
    %cst = arith.constant 0.000000e+00 : f32
    %2 = vector.broadcast %cst : f32 to vector<128x128xf32>
    %3 = arith.select %1, %2, %0 : vector<128x128xi1>, vector<128x128xf32>
    %c0_1 = arith.constant 0 : index
    %c0_2 = arith.constant 0 : index
    %4 = vector.load %arg3[%c0_1, %c0_2] : memref<128x128xf32, #tpu.memory_space<vmem>>, vector<128x128xf32>
    %5 = arith.mulf %4, %3 : vector<128x128xf32>
    %c0_3 = arith.constant 0 : index
    %c0_4 = arith.constant 0 : index
    %6 = vector.load %arg0[%c0_3, %c0_4] : memref<128x128xf32, #tpu.memory_space<vmem>>, vector<128x128xf32>
    %cst_5 = arith.constant dense<0.000000e+00> : vector<128x128xf32>
    %7 = tpu.matmul %6, %5, %cst_5 {dimension_numbers = #tpu.dot_dimension_numbers<[1], [0], [0], [1], [0, 0, 1, 1], [], []>} : vector<128x128xf32>, vector<128x128xf32>, vector<128x128xf32> -> vector<128x128xf32>
    %8 = vector.extract_strided_slice %7 {offsets = [0, 16], sizes = [128, 1], strides = [1, 1]} : vector<128x128xf32> to vector<128x1xf32>
    %c111_i32 = arith.constant 111 : i32
    %9 = tpu.dynamic_rotate %7 by %c111_i32 dim 1 : vector<128x128xf32>, i32 -> vector<128x128xf32>
    %cst_6 = arith.constant 0.000000e+00 : f32
    %10 = vector.broadcast %cst_6 : f32 to vector<128x128xf32>
    %11 = arith.cmpf ogt, %9, %10 : vector<128x128xf32>
    %12 = vector.broadcast %8 : vector<128x1xf32> to vector<128x128xf32>
    %13 = arith.mulf %12, %7 : vector<128x128xf32>
    %14 = arith.divf %13, %9 : vector<128x128xf32>
    %cst_7 = arith.constant 0.000000e+00 : f32
    %15 = vector.broadcast %cst_7 : f32 to vector<128x128xf32>
    %16 = arith.select %11, %14, %15 : vector<128x128xi1>, vector<128x128xf32>
    %c0_8 = arith.constant 0 : index
    %c0_9 = arith.constant 0 : index
    %17 = vector.load %arg4[%c0_8, %c0_9] : memref<128x128xf32, #tpu.memory_space<vmem>>, vector<128x128xf32>
    %cst_10 = arith.constant dense<0.000000e+00> : vector<128x128xf32>
    %18 = tpu.matmul %16, %17, %cst_10 {dimension_numbers = #tpu.dot_dimension_numbers<[1], [0], [0], [1], [0, 0, 1, 1], [], []>} : vector<128x128xf32>, vector<128x128xf32>, vector<128x128xf32> -> vector<128x128xf32>
    %c0_11 = arith.constant 0 : index
    %c0_12 = arith.constant 0 : index
    %19 = vector.load %arg5[%c0_11, %c0_12] : memref<1x128xf32, #tpu.memory_space<vmem>>, vector<1x128xf32>
    %20 = vector.broadcast %19 : vector<1x128xf32> to vector<128x128xf32>
    %21 = arith.addf %18, %20 : vector<128x128xf32>
    %cst_13 = arith.constant 0.000000e+00 : f32
    %22 = vector.broadcast %cst_13 : f32 to vector<128x128xf32>
    %23 = arith.maximumf %21, %22 : vector<128x128xf32>
    %c0_14 = arith.constant 0 : index
    %c0_15 = arith.constant 0 : index
    %24 = vector.load %arg6[%c0_14, %c0_15] : memref<128x128xf32, #tpu.memory_space<vmem>>, vector<128x128xf32>
    %cst_16 = arith.constant dense<0.000000e+00> : vector<128x128xf32>
    %25 = tpu.matmul %23, %24, %cst_16 {dimension_numbers = #tpu.dot_dimension_numbers<[1], [0], [0], [1], [0, 0, 1, 1], [], []>} : vector<128x128xf32>, vector<128x128xf32>, vector<128x128xf32> -> vector<128x128xf32>
    %c0_17 = arith.constant 0 : index
    %c0_18 = arith.constant 0 : index
    %26 = vector.load %arg1[%c0_17, %c0_18] : memref<128x128xf32, #tpu.memory_space<vmem>>, vector<128x128xf32>
    %cst_19 = arith.constant dense<0.000000e+00> : vector<128x128xf32>
    %27 = tpu.matmul %26, %25, %cst_19 {dimension_numbers = #tpu.dot_dimension_numbers<[1], [0], [0], [1], [0, 0, 1, 1], [], []>} : vector<128x128xf32>, vector<128x128xf32>, vector<128x128xf32> -> vector<128x128xf32>
    %c0_20 = arith.constant 0 : index
    %c0_21 = arith.constant 0 : index
    %28 = vector.load %arg7[%c0_20, %c0_21] : memref<1x128xf32, #tpu.memory_space<vmem>>, vector<1x128xf32>
    %29 = vector.broadcast %28 : vector<1x128xf32> to vector<128x128xf32>
    %30 = arith.addf %27, %29 : vector<128x128xf32>
    %cst_22 = arith.constant dense<0xFF800000> : vector<128xf32>
    %31 = vector.multi_reduction <maximumf>, %30, %cst_22 [1] : vector<128x128xf32> to vector<128xf32>
    %32 = vector.shape_cast %31 : vector<128xf32> to vector<128x1xf32>
    %33 = vector.broadcast %32 : vector<128x1xf32> to vector<128x128xf32>
    %34 = arith.subf %30, %33 : vector<128x128xf32>
    %35 = math.exp %34 : vector<128x128xf32>
    %cst_23 = arith.constant dense<0.000000e+00> : vector<128xf32>
    %36 = vector.multi_reduction <add>, %35, %cst_23 [1] : vector<128x128xf32> to vector<128xf32>
    %37 = vector.shape_cast %36 : vector<128xf32> to vector<128x1xf32>
    %38 = math.log %37 : vector<128x1xf32>
    %39 = vector.broadcast %38 : vector<128x1xf32> to vector<128x128xf32>
    %40 = arith.subf %34, %39 : vector<128x128xf32>
    %c0_24 = arith.constant 0 : index
    %c0_25 = arith.constant 0 : index
    %41 = vector.load %arg8[%c0_24, %c0_25] : memref<128x128xf32, #tpu.memory_space<vmem>>, vector<128x128xf32>
    tpu.vector_store %arg8[%c0_24, %c0_25], %40 {strides = array<i32>} : memref<128x128xf32, #tpu.memory_space<vmem>>, vector<128x128xf32>,
    return
  }
}

</mosaic_0001>

<bundles_post_ra>
// kernel: tpu_custom_call.1
= control target key start
LH: loop header
LB: loop body
LE: loop exit
PB: predicated region body
PF: predicated region fallthrough
CT: control target
= control target key end

     0   :  { %13 = vsyncpa [#allocation3], 0  ;;  %s2397_s0 = inlined_call_operand.hbm [shape: f32[128,128], index: 0, kind: input, shape index: {}]   ;;  %s2398_s1 = inlined_call_operand.hbm [shape: f32[128,128], index: 1, kind: input, shape index: {}]   ;;  %s2399_s2 = inlined_call_operand.hbm [shape: f32[128,128], index: 2, kind: input, shape index: {}]   ;;  %s2400_s3 = inlined_call_operand.hbm [shape: f32[128,128], index: 3, kind: input, shape index: {}]   ;;  %s2401_s4 = inlined_call_operand.hbm [shape: f32[128,128], index: 4, kind: input, shape index: {}]   ;;  %s2402_s5 = inlined_call_operand.vmem [shape: f32[1,128], index: 5, kind: input, shape index: {}]   ;;  %s2403_s6 = inlined_call_operand.hbm [shape: f32[128,128], index: 6, kind: input, shape index: {}]   ;;  %s2404_s7 = inlined_call_operand.vmem [shape: f32[1,128], index: 7, kind: input, shape index: {}]   ;;  %s2405_s8 = inlined_call_operand.hbm [shape: f32[128,128], index: 8, kind: output, shape index: {}]  }
   0x1   :  { %14 = vsyncpa [#allocation6], 0 }
   0x2   :  { %15 = vsyncpa [#allocation9], 0 }
   0x3   :  { %16 = vsyncpa [#allocation12], 0 }
   0x4   :  { %17 = vsyncpa [#allocation4], 0  ;;  %s2025_s27 = smov [#allocation5]   ;;  %s2026_s29 = smov [#allocation8]  }
   0x5   :  { %s35_s28 = sshll.u32 %s2025_s27, 4  ;;  %s59_s30 = sshll.u32 %s2026_s29, 4  ;;  %s36_s28 = int_to_ptr.vmem [resolvable:$true] %s35_s28  ;;  %s2081_s30 = int_to_ptr.vmem [resolvable:$true] %s59_s30 }
   0x6   :  { %s1861_s11 = scalar_lea.hbm %s2398_s1, 2048 }
   0x7   :  { %p1862_p0 = scmp.ne.s32.totalorder %s2398_s1, %s1861_s11  ;;  %p1865_p1 = scmp.lt.u32.totalorder %s1861_s11, %s2398_s1 }
   0x9   :  { %p1867_p2 = pnand %p1865_p1, %p1862_p0 }
   0xb   :  { %1870 = shalt.err (!%p1867_p2)
}
   0xc   :  { %s1871_s16 = scalar_lea.vmem %s36_s28, 2048  ;;  %p1876_p4 = scmp.lt.s32.totalorder %s36_s28, %s36_s28 }
   0xd   :  { %p1872_p3 = scmp.ne.s32.totalorder %s36_s28, %s1871_s16  ;;  %p1877_p5 = scmp.lt.s32.totalorder %s1871_s16, %s1871_s16 }
   0xf   :  { %p1878_p6 = por %p1877_p5, %p1876_p4 }
  0x11   :  { %p1879_p7 = pnand %p1878_p6, %p1872_p3 }
  0x13   :  { %1882 = shalt.err (!%p1879_p7)
}
  0x14   :  { %s2027_s17 = smov 128   ;;  %s2028_s18 = smov 8  }
  0x15   :  { %41 = dma.hbm_to_vmem [thread:$0]  %s2398_s1, 2048, %s36_s28, [#allocation6], %s2027_s17, %s2027_s17, %s2028_s18  }
  0x16   :  { %s1883_s23 = scalar_lea.hbm %s2400_s3, 2048 }
  0x17   :  { %p1884_p8 = scmp.ne.s32.totalorder %s2400_s3, %s1883_s23  ;;  %p1887_p9 = scmp.lt.u32.totalorder %s1883_s23, %s2400_s3 }
  0x19   :  { %p1889_p10 = pnand %p1887_p9, %p1884_p8 }
  0x1b   :  { %1892 = shalt.err (!%p1889_p10)
}
  0x1c   :  { %s1893_s29 = scalar_lea.vmem %s2081_s30, 2048  ;;  %p1898_p12 = scmp.lt.s32.totalorder %s2081_s30, %s2081_s30 }
  0x1d   :  { %p1894_p11 = scmp.ne.s32.totalorder %s2081_s30, %s1893_s29  ;;  %p1899_p13 = scmp.lt.s32.totalorder %s1893_s29, %s1893_s29 }
  0x1f   :  { %p1900_p0 = por %p1899_p13, %p1898_p12 }
  0x21   :  { %p1901_p1 = pnand %p1900_p0, %p1894_p11 }
  0x23   :  { %1904 = shalt.err (!%p1901_p1)
}
  0x24   :  { %65 = dma.hbm_to_vmem [thread:$0]  %s2400_s3, 2048, %s2081_s30, [#allocation9], %s2027_s17, %s2027_s17, %s2028_s18  }
  0x25   :  { %s2029_s9 = smov [#allocation2]   ;;  %s2030_s11 = smov [#allocation7]  }
  0x26   :  { %s23_s10 = sshll.u32 %s2029_s9, 4  ;;  %s47_s12 = sshll.u32 %s2030_s11, 4  ;;  %s24_s10 = int_to_ptr.vmem [resolvable:$true] %s23_s10  ;;  %s2118_s12 = int_to_ptr.vmem [resolvable:$true] %s47_s12 }
  0x27   :  { %s1905_s15 = scalar_lea.hbm %s2397_s0, 2048 }
  0x28   :  { %p1906_p2 = scmp.ne.s32.totalorder %s2397_s0, %s1905_s15  ;;  %p1909_p3 = scmp.lt.u32.totalorder %s1905_s15, %s2397_s0 }
  0x2a   :  { %p1911_p4 = pnand %p1909_p3, %p1906_p2 }
  0x2c   :  { %1914 = shalt.err (!%p1911_p4)
}
  0x2d   :  { %s1915_s3 = scalar_lea.vmem %s24_s10, 2048  ;;  %p1920_p6 = scmp.lt.s32.totalorder %s24_s10, %s24_s10 }
  0x2e   :  { %p1916_p5 = scmp.ne.s32.totalorder %s24_s10, %s1915_s3  ;;  %p1921_p7 = scmp.lt.s32.totalorder %s1915_s3, %s1915_s3 }
  0x30   :  { %p1922_p8 = por %p1921_p7, %p1920_p6 }
  0x32   :  { %p1923_p9 = pnand %p1922_p8, %p1916_p5 }
  0x34   :  { %1926 = shalt.err (!%p1923_p9)
}
  0x35   :  { %29 = dma.hbm_to_vmem [thread:$0]  %s2397_s0, 2048, %s24_s10, [#allocation3], %s2027_s17, %s2027_s17, %s2028_s18  }
  0x36   :  { %s1927_s25 = scalar_lea.hbm %s2399_s2, 2048 }
  0x37   :  { %p1928_p10 = scmp.ne.s32.totalorder %s2399_s2, %s1927_s25  ;;  %p1931_p11 = scmp.lt.u32.totalorder %s1927_s25, %s2399_s2 }
  0x39   :  { %p1933_p12 = pnand %p1931_p11, %p1928_p10 }
  0x3b   :  { %1936 = shalt.err (!%p1933_p12)
}
  0x3c   :  { %s1937_s28 = scalar_lea.vmem %s2118_s12, 2048  ;;  %p1942_p0 = scmp.lt.s32.totalorder %s2118_s12, %s2118_s12 }
  0x3d   :  { %p1938_p13 = scmp.ne.s32.totalorder %s2118_s12, %s1937_s28  ;;  %p1943_p1 = scmp.lt.s32.totalorder %s1937_s28, %s1937_s28 }
  0x3f   :  { %p1944_p2 = por %p1943_p1, %p1942_p0 }
  0x41   :  { %p1945_p3 = pnand %p1944_p2, %p1938_p13 }
  0x43   :  { %1948 = shalt.err (!%p1945_p3)
}
  0x44   :  { %53 = dma.hbm_to_vmem [thread:$0]  %s2399_s2, 2048, %s2118_s12, [#allocation6], %s2027_s17, %s2027_s17, %s2028_s18  }
  0x45   :  { %s2031_s10 = smov [#allocation10]   ;;  %s2032_s13 = smov [#allocation11]  }
  0x46   :  { %s71_s11 = sshll.u32 %s2031_s10, 4  ;;  %s85_s14 = sshll.u32 %s2032_s13, 4  ;;  %s72_s11 = int_to_ptr.vmem [resolvable:$true] %s71_s11  ;;  %s2155_s14 = int_to_ptr.vmem [resolvable:$true] %s85_s14 }
  0x47   :  { %s1949_s19 = scalar_lea.hbm %s2401_s4, 2048 }
  0x48   :  { %p1950_p4 = scmp.ne.s32.totalorder %s2401_s4, %s1949_s19  ;;  %p1953_p5 = scmp.lt.u32.totalorder %s1949_s19, %s2401_s4 }
  0x4a   :  { %p1955_p6 = pnand %p1953_p5, %p1950_p4 }
  0x4c   :  { %1958 = shalt.err (!%p1955_p6)
}
  0x4d   :  { %s1959_s2 = scalar_lea.vmem %s72_s11, 2048  ;;  %p1964_p8 = scmp.lt.s32.totalorder %s72_s11, %s72_s11 }
  0x4e   :  { %p1960_p7 = scmp.ne.s32.totalorder %s72_s11, %s1959_s2  ;;  %p1965_p9 = scmp.lt.s32.totalorder %s1959_s2, %s1959_s2 }
  0x50   :  { %p1966_p10 = por %p1965_p9, %p1964_p8 }
  0x52   :  { %p1967_p11 = pnand %p1966_p10, %p1960_p7 }
  0x54   :  { %1970 = shalt.err (!%p1967_p11)
}
  0x55   :  { %77 = dma.hbm_to_vmem [thread:$0]  %s2401_s4, 2048, %s72_s11, [#allocation9], %s2027_s17, %s2027_s17, %s2028_s18  }
  0x56   :  { %s1971_s25 = scalar_lea.hbm %s2403_s6, 2048 }
  0x57   :  { %p1972_p12 = scmp.ne.s32.totalorder %s2403_s6, %s1971_s25  ;;  %p1975_p13 = scmp.lt.u32.totalorder %s1971_s25, %s2403_s6 }
  0x59   :  { %p1977_p0 = pnand %p1975_p13, %p1972_p12 }
  0x5b   :  { %1980 = shalt.err (!%p1977_p0)
}
  0x5c   :  { %s1981_s28 = scalar_lea.vmem %s2155_s14, 2048  ;;  %p1986_p2 = scmp.lt.s32.totalorder %s2155_s14, %s2155_s14 }
  0x5d   :  { %p1982_p1 = scmp.ne.s32.totalorder %s2155_s14, %s1981_s28  ;;  %p1987_p3 = scmp.lt.s32.totalorder %s1981_s28, %s1981_s28 }
  0x5f   :  { %p1988_p4 = por %p1987_p3, %p1986_p2 }
  0x61   :  { %p1989_p5 = pnand %p1988_p4, %p1982_p1 }
  0x63   :  { %1992 = shalt.err (!%p1989_p5)
}
  0x64   :  { %91 = dma.hbm_to_vmem [thread:$0]  %s2403_s6, 2048, %s2155_s14, [#allocation12], %s2027_s17, %s2027_s17, %s2028_s18  }
  0x65   :  { %2015 = dma.done.wait [#allocation3], 2048  }
  0x66   :  { %2016 = vsyncadd [#allocation3], 4294965248 }
  0x67   :  { %2017 = dma.done.wait [#allocation6], 4096  }
  0x68   :  { %2018 = vsyncadd [#allocation6], 4294963200 }
  0x69   :  { %2019 = dma.done.wait [#allocation9], 4096  }
  0x6a   :  { %2020 = vsyncadd [#allocation9], 4294963200 }
  0x6b   :  { %2021 = dma.done.wait [#allocation12], 2048  }
  0x6c   :  { %2022 = vsyncadd [#allocation12], 4294965248  ;;  %v2033_v0 = vmov 16   ;;  %v112_v1 = vld [vmem:[#allocation7] sm:$0xff]  ;;  %v113_v2 = vld [vmem:[#allocation7 + $0x8] sm:$0xff]  ;;  %s2034_s6 = smov 111  }
  0x6d   :  { %1763 = vset.pattern.permute.xlu1 %v2033_v0  ;;  %1764 = vset.pattern.permute.xlu0 %v2033_v0  ;;  %v160_v3 = vld [vmem:[#allocation8] sm:$0xff]  ;;  %vm128_vm0 = vcmp.ne.f32.partialorder %v112_v1, %v112_v1  ;;  %vm129_vm1 = vcmp.ne.f32.partialorder %v113_v2, %v113_v2  ;;  %v161_v4 = vld [vmem:[#allocation8 + $0x8] sm:$0xff]  ;;  %v114_v5 = vld [vmem:[#allocation7 + $0x10] sm:$0xff] }
  0x6e   :  { %v115_v6 = vld [vmem:[#allocation7 + $0x18] sm:$0xff]  ;;  %v144_v7 = vsel %vm128_vm0, 0.0, %v112_v1  ;;  %v145_v8 = vsel %vm129_vm1, 0.0, %v113_v2  ;;  %vm130_vm2 = vcmp.ne.f32.partialorder %v114_v5, %v114_v5  ;;  %v162_v9 = vld [vmem:[#allocation8 + $0x10] sm:$0xff]  ;;  %v116_v11 = vld [vmem:[#allocation7 + $0x20] sm:$0xff] }
  0x6f   :  { %vm131_vm3 = vcmp.ne.f32.partialorder %v115_v6, %v115_v6  ;;  %v163_v10 = vld [vmem:[#allocation8 + $0x18] sm:$0xff]  ;;  %v176_v12 = vmul.f32 %v160_v3, %v144_v7  ;;  %v177_v13 = vmul.f32 %v161_v4, %v145_v8  ;;  %v146_v14 = vsel %vm130_vm2, 0.0, %v114_v5  ;;  %v117_v16 = vld [vmem:[#allocation7 + $0x28] sm:$0xff]  ;;  %v164_v17 = vld [vmem:[#allocation8 + $0x20] sm:$0xff] }
  0x70   :  { %v147_v15 = vsel %vm131_vm3, 0.0, %v115_v6  ;;  %v165_v18 = vld [vmem:[#allocation8 + $0x28] sm:$0xff]  ;;  %v178_v19 = vmul.f32 %v162_v9, %v146_v14  ;;  %vm132_vm4 = vcmp.ne.f32.partialorder %v116_v11, %v116_v11  ;;  %vm133_vm5 = vcmp.ne.f32.partialorder %v117_v16, %v117_v16  ;;  %v118_v21 = vld [vmem:[#allocation7 + $0x30] sm:$0xff]  ;;  %v119_v22 = vld [vmem:[#allocation7 + $0x38] sm:$0xff] }
  0x71   :  { %v179_v20 = vmul.f32 %v163_v10, %v147_v15  ;;  %v1624_v23 = vpack.c.bf16 %v177_v13, %v176_v12  ;;  %v148_v24 = vsel %vm132_vm4, 0.0, %v116_v11  ;;  %v149_v25 = vsel %vm133_vm5, 0.0, %v117_v16  ;;  %v120_v26 = vld [vmem:[#allocation7 + $0x40] sm:$0xff]  ;;  %v121_v27 = vld [vmem:[#allocation7 + $0x48] sm:$0xff]  ;;  %v166_v31 = vld [vmem:[#allocation8 + $0x30] sm:$0xff] }
  0x72   :  { %vm134_vm6 = vcmp.ne.f32.partialorder %v118_v21, %v118_v21  ;;  %v180_v29 = vmul.f32 %v164_v17, %v148_v24  ;;  %v181_v30 = vmul.f32 %v165_v18, %v149_v25  ;;  %vm135_vm7 = vcmp.ne.f32.partialorder %v119_v22, %v119_v22  ;;  %v167_v32 = vld [vmem:[#allocation8 + $0x38] sm:$0xff]  ;;  %v122_v35 = vld [vmem:[#allocation7 + $0x50] sm:$0xff]  ;;  %v168_v42 = vld [vmem:[#allocation8 + $0x40] sm:$0xff] }
  0x73   :  { %v1628_v28 = vpack.c.bf16 %v179_v20, %v178_v19  ;;  %1625 = vmatprep.subr.bf16.mxu0 %v1624_v23  ;;  %v150_v33 = vsel %vm134_vm6, 0.0, %v118_v21  ;;  %v151_v34 = vsel %vm135_vm7, 0.0, %v119_v22  ;;  %vm136_vm8 = vcmp.ne.f32.partialorder %v120_v26, %v120_v26  ;;  %v123_v36 = vld [vmem:[#allocation7 + $0x58] sm:$0xff]  ;;  %v169_v43 = vld [vmem:[#allocation8 + $0x48] sm:$0xff]  ;;  %v192_v44 = vld [vmem:[#allocation2] sm:$0xff] }
  0x74   :  { %vm137_vm9 = vcmp.ne.f32.partialorder %v121_v27, %v121_v27  ;;  %1627 = vmatpush3.bf16.msra.mxu0 %v1624_v23  ;;  %v1632_v37 = vpack.c.bf16 %v181_v30, %v180_v29  ;;  %v182_v38 = vmul.f32 %v166_v31, %v150_v33  ;;  %v183_v39 = vmul.f32 %v167_v32, %v151_v34  ;;  %v124_v45 = vld [vmem:[#allocation7 + $0x60] sm:$0xff]  ;;  %v125_v46 = vld [vmem:[#allocation7 + $0x68] sm:$0xff]  ;;  %v170_v52 = vld [vmem:[#allocation8 + $0x50] sm:$0xff] }
  0x75   :  { %1629 = vmatprep.subr.bf16.mxu0 %v1628_v28  ;;  %v152_v40 = vsel %vm136_vm8, 0.0, %v120_v26  ;;  %v153_v41 = vsel %vm137_vm9, 0.0, %v121_v27  ;;  %vm138_vm10 = vcmp.ne.f32.partialorder %v122_v35, %v122_v35  ;;  %vm139_vm11 = vcmp.ne.f32.partialorder %v123_v36, %v123_v36  ;;  %1432 = vmatprep.mubr.f32.mxu0 %v192_v44  ;;  %v171_v53 = vld [vmem:[#allocation8 + $0x58] sm:$0xff]  ;;  %v126_v54 = vld [vmem:[#allocation7 + $0x70] sm:$0xff]  ;;  %v172_v61 = vld [vmem:[#allocation8 + $0x60] sm:$0xff] }
  0x76   :  { %v1636_v47 = vpack.c.bf16 %v183_v39, %v182_v38  ;;  %v184_v48 = vmul.f32 %v168_v42, %v152_v40  ;;  %v185_v49 = vmul.f32 %v169_v43, %v153_v41  ;;  %v154_v50 = vsel %vm138_vm10, 0.0, %v122_v35  ;;  %v127_v55 = vld [vmem:[#allocation7 + $0x78] sm:$0xff]  ;;  %v173_v62 = vld [vmem:[#allocation8 + $0x68] sm:$0xff]  ;;  %v174_v4 = vld [vmem:[#allocation8 + $0x70] sm:$0xff] }
  0x77   :  { %v155_v51 = vsel %vm139_vm11, 0.0, %v123_v36  ;;  %vm140_vm12 = vcmp.ne.f32.partialorder %v124_v45, %v124_v45  ;;  %vm141_vm13 = vcmp.ne.f32.partialorder %v125_v46, %v125_v46  ;;  %v186_v57 = vmul.f32 %v170_v52, %v154_v50  ;;  %v175_v5 = vld [vmem:[#allocation8 + $0x78] sm:$0xff]  ;;  %v193_v10 = vld [vmem:[#allocation2 + $0x8] sm:$0xff]  ;;  %v194_v11 = vld [vmem:[#allocation2 + $0x10] sm:$0xff] }
  0x78   :  { %1631 = vmatpush3.bf16.msra.mxu0 %v1628_v28  ;;  %v1640_v56 = vpack.c.bf16 %v185_v49, %v184_v48  ;;  %v187_v58 = vmul.f32 %v171_v53, %v155_v51  ;;  %v156_v59 = vsel %vm140_vm12, 0.0, %v124_v45  ;;  %v157_v60 = vsel %vm141_vm13, 0.0, %v125_v46  ;;  %v195_v12 = vld [vmem:[#allocation2 + $0x18] sm:$0xff]  ;;  %v196_v13 = vld [vmem:[#allocation2 + $0x20] sm:$0xff]  ;;  %v197_v14 = vld [vmem:[#allocation2 + $0x28] sm:$0xff] }
  0x79   :  { %1633 = vmatprep.subr.bf16.mxu0 %v1632_v37  ;;  %vm142_vm14 = vcmp.ne.f32.partialorder %v126_v54, %v126_v54  ;;  %vm143_vm15 = vcmp.ne.f32.partialorder %v127_v55, %v127_v55  ;;  %v188_v0 = vmul.f32 %v172_v61, %v156_v59  ;;  %v189_v1 = vmul.f32 %v173_v62, %v157_v60  ;;  %v198_v15 = vld [vmem:[#allocation2 + $0x30] sm:$0xff]  ;;  %v199_v16 = vld [vmem:[#allocation2 + $0x38] sm:$0xff]  ;;  %v200_v17 = vld [vmem:[#allocation2 + $0x40] sm:$0xff] }
  0x7a   :  { %v1644_v63 = vpack.c.bf16 %v187_v58, %v186_v57  ;;  %v158_v2 = vsel %vm142_vm14, 0.0, %v126_v54  ;;  %v159_v3 = vsel %vm143_vm15, 0.0, %v127_v55  ;;  %v201_v18 = vld [vmem:[#allocation2 + $0x48] sm:$0xff]  ;;  %v202_v19 = vld [vmem:[#allocation2 + $0x50] sm:$0xff]  ;;  %v203_v20 = vld [vmem:[#allocation2 + $0x58] sm:$0xff] }
  0x7b   :  { %v1648_v6 = vpack.c.bf16 %v189_v1, %v188_v0  ;;  %v190_v7 = vmul.f32 %v174_v4, %v158_v2  ;;  %v191_v8 = vmul.f32 %v175_v5, %v159_v3  ;;  %v204_v21 = vld [vmem:[#allocation2 + $0x60] sm:$0xff]  ;;  %v205_v22 = vld [vmem:[#allocation2 + $0x68] sm:$0xff]  ;;  %v206_v23 = vld [vmem:[#allocation2 + $0x70] sm:$0xff] }
  0x7c   :  { %1635 = vmatpush3.bf16.msra.mxu0 %v1632_v37  ;;  %v207_v24 = vld [vmem:[#allocation2 + $0x78] sm:$0xff]  ;;  %v545_v25 = vld [vmem:[#allocation10] sm:$0xff]  ;;  %v546_v26 = vld [vmem:[#allocation10 + $0x8] sm:$0xff] }
  0x7d   :  { %1637 = vmatprep.subr.bf16.mxu0 %v1636_v47  ;;  %v1652_v9 = vpack.c.bf16 %v191_v8, %v190_v7  ;;  %v547_v27 = vld [vmem:[#allocation10 + $0x10] sm:$0xff]  ;;  %v1656_v28 = vpack.c.bf16 %v546_v26, %v545_v25  ;;  %v548_v29 = vld [vmem:[#allocation10 + $0x18] sm:$0xff]  ;;  %v549_v31 = vld [vmem:[#allocation10 + $0x20] sm:$0xff] }
  0x7e   :  { %v1660_v30 = vpack.c.bf16 %v548_v29, %v547_v27  ;;  %v550_v32 = vld [vmem:[#allocation10 + $0x28] sm:$0xff]  ;;  %v551_v34 = vld [vmem:[#allocation10 + $0x30] sm:$0xff]  ;;  %v552_v35 = vld [vmem:[#allocation10 + $0x38] sm:$0xff] }
  0x7f   :  { %1657 = vmatprep.subr.bf16.mxu1 %v1656_v28  ;;  %v1664_v33 = vpack.c.bf16 %v550_v32, %v549_v31  ;;  %v1668_v36 = vpack.c.bf16 %v552_v35, %v551_v34  ;;  %v553_v37 = vld [vmem:[#allocation10 + $0x40] sm:$0xff]  ;;  %v554_v38 = vld [vmem:[#allocation10 + $0x48] sm:$0xff]  ;;  %v555_v40 = vld [vmem:[#allocation10 + $0x50] sm:$0xff] }
  0x80   :  { %1639 = vmatpush3.bf16.msra.mxu0 %v1636_v47  ;;  %1659 = vmatpush3.bf16.msra.mxu1 %v1656_v28  ;;  %v1672_v39 = vpack.c.bf16 %v554_v38, %v553_v37  ;;  %v556_v41 = vld [vmem:[#allocation10 + $0x58] sm:$0xff]  ;;  %v557_v43 = vld [vmem:[#allocation10 + $0x60] sm:$0xff]  ;;  %v558_v44 = vld [vmem:[#allocation10 + $0x68] sm:$0xff] }
  0x81   :  { %1641 = vmatprep.subr.bf16.mxu0 %v1640_v56  ;;  %1661 = vmatprep.subr.bf16.mxu1 %v1660_v30  ;;  %v1676_v42 = vpack.c.bf16 %v556_v41, %v555_v40  ;;  %v1680_v46 = vpack.c.bf16 %v558_v44, %v557_v43  ;;  %v559_v48 = vld [vmem:[#allocation10 + $0x70] sm:$0xff]  ;;  %v560_v49 = vld [vmem:[#allocation10 + $0x78] sm:$0xff]  ;;  %v729_v1 = vld [vmem:[#allocation11] sm:$0xff] }
  0x82   :  { %v1684_v51 = vpack.c.bf16 %v560_v49, %v559_v48  ;;  %v730_v2 = vld [vmem:[#allocation11 + $0x8] sm:$0xff]  ;;  %v731_v3 = vld [vmem:[#allocation11 + $0x10] sm:$0xff]  ;;  %v732_v5 = vld [vmem:[#allocation11 + $0x18] sm:$0xff] }
  0x83   :  { %v1688_v4 = vpack.c.bf16 %v730_v2, %v729_v1  ;;  %v733_v7 = vld [vmem:[#allocation11 + $0x20] sm:$0xff]  ;;  %v734_v8 = vld [vmem:[#allocation11 + $0x28] sm:$0xff] }
  0x84   :  { %1643 = vmatpush3.bf16.msra.mxu0 %v1640_v56  ;;  %1663 = vmatpush3.bf16.msra.mxu1 %v1660_v30 }
  0x85   :  { %1645 = vmatprep.subr.bf16.mxu0 %v1644_v63  ;;  %1665 = vmatprep.subr.bf16.mxu1 %v1664_v33 }
  0x88   :  { %1647 = vmatpush3.bf16.msra.mxu0 %v1644_v63  ;;  %1667 = vmatpush3.bf16.msra.mxu1 %v1664_v33 }
  0x89   :  { %1649 = vmatprep.subr.bf16.mxu0 %v1648_v6  ;;  %1669 = vmatprep.subr.bf16.mxu1 %v1668_v36 }
  0x8c   :  { %1651 = vmatpush3.bf16.msra.mxu0 %v1648_v6  ;;  %1671 = vmatpush3.bf16.msra.mxu1 %v1668_v36  ;;  %v1692_v6 = vpack.c.bf16 %v732_v5, %v731_v3 }
  0x8d   :  { %1653 = vmatprep.subr.bf16.mxu0 %v1652_v9  ;;  %1673 = vmatprep.subr.bf16.mxu1 %v1672_v39 }
  0x90   :  { %1655 = vmatpush3.bf16.msra.mxu0 %v1652_v9  ;;  %1675 = vmatpush3.bf16.msra.mxu1 %v1672_v39  ;;  %v1696_v9 = vpack.c.bf16 %v734_v8, %v733_v7 }
  0x91   :  { %1677 = vmatprep.subr.bf16.mxu1 %v1676_v42  ;;  %1689 = vmatprep.subr.bf16.mxu0 %v1688_v4 }
  0x93   :  { %1433 = vmatmul.mubr.f32.vlgmr.msra.gmra.mrb[0].mxu0 %v193_v10  ;;  %v735_v10 = vld [vmem:[#allocation11 + $0x30] sm:$0xff] }
  0x94   :  { %1435 = vmatprep.mubr.f32.mxu0 %v194_v11  ;;  %1679 = vmatpush3.bf16.msra.mxu1 %v1676_v42  ;;  %v736_v11 = vld [vmem:[#allocation11 + $0x38] sm:$0xff] }
  0x95   :  { %1681 = vmatprep.subr.bf16.mxu1 %v1680_v46  ;;  %1691 = vmatpush3.bf16.msra.mxu0 %v1688_v4 }
  0x96   :  { %1693 = vmatprep.subr.bf16.mxu0 %v1692_v6 }
  0x97   :  { %1436 = vmatmul.mubr.f32.gmra.mrb[2].mxu0 %v195_v12  ;;  %v1700_v12 = vpack.c.bf16 %v736_v11, %v735_v10 }
  0x98   :  { %1438 = vmatprep.mubr.f32.mxu0 %v196_v13  ;;  %1683 = vmatpush3.bf16.msra.mxu1 %v1680_v46  ;;  %v737_v13 = vld [vmem:[#allocation11 + $0x40] sm:$0xff] }
  0x99   :  { %1685 = vmatprep.subr.bf16.mxu1 %v1684_v51  ;;  %1695 = vmatpush3.bf16.msra.mxu0 %v1692_v6 }
  0x9a   :  { %1697 = vmatprep.subr.bf16.mxu0 %v1696_v9 }
  0x9b   :  { %1439 = vmatmul.mubr.f32.gmra.mrb[4].mxu0 %v197_v14  ;;  %v738_v14 = vld [vmem:[#allocation11 + $0x48] sm:$0xff] }
  0x9c   :  { %1441 = vmatprep.mubr.f32.mxu0 %v198_v15  ;;  %1687 = vmatpush3.bf16.msra.mxu1 %v1684_v51  ;;  %v1704_v15 = vpack.c.bf16 %v738_v14, %v737_v13 }
  0x9d   :  { %1699 = vmatpush3.bf16.msra.mxu0 %v1696_v9 }
  0x9e   :  { %1701 = vmatprep.subr.bf16.mxu0 %v1700_v12 }
  0x9f   :  { %1442 = vmatmul.mubr.f32.gmra.mrb[6].mxu0 %v199_v16  ;;  %v739_v16 = vld [vmem:[#allocation11 + $0x50] sm:$0xff] }
  0xa0   :  { %1444 = vmatprep.mubr.f32.mxu0 %v200_v17  ;;  %v740_v17 = vld [vmem:[#allocation11 + $0x58] sm:$0xff] }
  0xa1   :  { %1703 = vmatpush3.bf16.msra.mxu0 %v1700_v12 }
  0xa2   :  { %1705 = vmatprep.subr.bf16.mxu0 %v1704_v15 }
  0xa3   :  { %1445 = vmatmul.mubr.f32.gmra.mrb[8].mxu0 %v201_v18  ;;  %v1708_v18 = vpack.c.bf16 %v740_v17, %v739_v16 }
  0xa4   :  { %1447 = vmatprep.mubr.f32.mxu0 %v202_v19  ;;  %v741_v19 = vld [vmem:[#allocation11 + $0x60] sm:$0xff] }
  0xa5   :  { %1707 = vmatpush3.bf16.msra.mxu0 %v1704_v15 }
  0xa6   :  { %1709 = vmatprep.subr.bf16.mxu0 %v1708_v18 }
  0xa7   :  { %1448 = vmatmul.mubr.f32.gmra.mrb[10].mxu0 %v203_v20  ;;  %v742_v20 = vld [vmem:[#allocation11 + $0x68] sm:$0xff] }
  0xa8   :  { %1450 = vmatprep.mubr.f32.mxu0 %v204_v21  ;;  %v1712_v21 = vpack.c.bf16 %v742_v20, %v741_v19 }
  0xa9   :  { %1711 = vmatpush3.bf16.msra.mxu0 %v1708_v18 }
  0xaa   :  { %1713 = vmatprep.subr.bf16.mxu0 %v1712_v21 }
  0xab   :  { %1451 = vmatmul.mubr.f32.gmra.mrb[12].mxu0 %v205_v22 }
  0xac   :  { %1453 = vmatprep.mubr.f32.mxu0 %v206_v23 }
  0xad   :  { %1715 = vmatpush3.bf16.msra.mxu0 %v1712_v21 }
  0xaf   :  { %1454 = vmatmul.mubr.f32.gmra.mrb[14].mxu0 %v207_v24 }
 0x166   :  { %v2192_v45 = vpop.f32.mrb[0].mxu0 }
 0x167   :  { %408 = vperm.xlu1 %1763, %v2192_v45   ;;  %355 = vrot.lane.b32.xlu0 %v2192_v45, %s2034_s6  ;;  %v2197_v47 = vpop.f32.mrb[1].mxu0 }
 0x16a   :  { %v2199_v50 = vpop.f32.mrb[2].mxu0 }
 0x16b   :  { %403 = vperm.xlu1 %1763, %v2197_v47   ;;  %353 = vrot.lane.b32.xlu0 %v2197_v47, %s2034_s6  ;;  %v2204_v52 = vpop.f32.mrb[3].mxu0 }
 0x16e   :  { %v2206_v53 = vpop.f32.mrb[4].mxu0 }
 0x16f   :  { %359 = vrot.lane.b32.xlu1 %v2199_v50, %s2034_s6  ;;  %357 = vrot.lane.b32.xlu0 %v2204_v52, %s2034_s6  ;;  %v2212_v54 = vpop.f32.mrb[5].mxu0 }
 0x172   :  { %v2214_v55 = vpop.f32.mrb[6].mxu0 }
 0x173   :  { %418 = vperm.xlu1 %1763, %v2199_v50   ;;  %413 = vperm.xlu0 %1764, %v2204_v52   ;;  %v2218_v56 = vpop.f32.mrb[7].mxu0 }
 0x176   :  { %v2220_v57 = vpop.f32.mrb[8].mxu0 }
 0x177   :  { %363 = vrot.lane.b32.xlu0 %v2206_v53, %s2034_s6  ;;  %361 = vrot.lane.b32.xlu1 %v2212_v54, %s2034_s6  ;;  %v2226_v58 = vpop.f32.mrb[9].mxu0 }
 0x17a   :  { %v2228_v59 = vpop.f32.mrb[10].mxu0 }
 0x17b   :  { %428 = vperm.xlu0 %1764, %v2206_v53   ;;  %423 = vperm.xlu1 %1763, %v2212_v54   ;;  %v2232_v60 = vpop.f32.mrb[11].mxu0 }
 0x17e   :  { %v2234_v61 = vpop.f32.mrb[12].mxu0 }
 0x17f   :  { %367 = vrot.lane.b32.xlu0 %v2214_v55, %s2034_s6  ;;  %365 = vrot.lane.b32.xlu1 %v2218_v56, %s2034_s6  ;;  %v2240_v62 = vpop.f32.mrb[13].mxu0 }
 0x182   :  { %v2242_v63 = vpop.f32.mrb[14].mxu0 }
 0x183   :  { %438 = vperm.xlu0 %1764, %v2214_v55   ;;  %433 = vperm.xlu1 %1763, %v2218_v56   ;;  %v2246_v0 = vpop.f32.mrb[15].mxu0 }
 0x187   :  { %371 = vrot.lane.b32.xlu0 %v2220_v57, %s2034_s6  ;;  %369 = vrot.lane.b32.xlu1 %v2226_v58, %s2034_s6 }
 0x18b   :  { %448 = vperm.xlu0 %1764, %v2220_v57   ;;  %443 = vperm.xlu1 %1763, %v2226_v58  }
 0x18f   :  { %375 = vrot.lane.b32.xlu0 %v2228_v59, %s2034_s6  ;;  %373 = vrot.lane.b32.xlu1 %v2232_v60, %s2034_s6 }
 0x193   :  { %458 = vperm.xlu0 %1764, %v2228_v59   ;;  %453 = vperm.xlu1 %1763, %v2232_v60  }
 0x197   :  { %379 = vrot.lane.b32.xlu0 %v2234_v61, %s2034_s6  ;;  %377 = vrot.lane.b32.xlu1 %v2240_v62, %s2034_s6 }
 0x19b   :  { %468 = vperm.xlu0 %1764, %v2234_v61   ;;  %463 = vperm.xlu1 %1763, %v2240_v62  }
 0x19f   :  { %383 = vrot.lane.b32.xlu0 %v2242_v63, %s2034_s6  ;;  %381 = vrot.lane.b32.xlu1 %v2246_v0, %s2034_s6 }
 0x1a3   :  { %478 = vperm.xlu0 %1764, %v2242_v63   ;;  %473 = vperm.xlu1 %1763, %v2246_v0  }
 0x1d9   :  { %v356_v22 = vpop.permute.xlu0 %355 }
 0x1da   :  { %vm386_vm1 = vcmp.gt.f32.partialorder %v356_v22, 0.0 }
 0x1dd   :  { %v354_v23 = vpop.permute.xlu0 %353 }
 0x1de   :  { %1765 = vrcp.f32 %v354_v23  ;;  %vm385_vm0 = vcmp.gt.f32.partialorder %v354_v23, 0.0 }
 0x1df   :  { %1767 = vrcp.f32 %v356_v22 }
 0x1e1   :  { %v358_v25 = vpop.permute.xlu0 %357 }
 0x1e2   :  { %1769 = vrcp.f32 %v358_v25  ;;  %vm387_vm2 = vcmp.gt.f32.partialorder %v358_v25, 0.0 }
 0x1e6   :  { %v409_v24 = vpop.permute.xlu1 %408 }
 0x1e7   :  { %v482_v26 = vmul.f32 %v2192_v45, %v409_v24 }
 0x1e8   :  { %v1766_v29 = vpop.eup %1765 }
 0x1e9   :  { %v1768_v30 = vpop.eup %1767 }
 0x1ea   :  { %v404_v27 = vpop.permute.xlu1 %403  ;;  %v500_v32 = vmul.f32 %v1768_v30, %v482_v26 }
 0x1eb   :  { %v481_v28 = vmul.f32 %v404_v27, %v2197_v47 }
 0x1ec   :  { %v1770_v37 = vpop.eup %1769 }
 0x1ed   :  { %v498_v31 = vmul.f32 %v1766_v29, %v481_v28 }
 0x1ee   :  { %v360_v33 = vpop.permute.xlu1 %359 }
 0x1ef   :  { %1771 = vrcp.f32 %v360_v33  ;;  %1488 = vmatprep.mubr.msk.f32.mxu1 %vm385_vm0, %v498_v31  ;;  %vm388_vm3 = vcmp.gt.f32.partialorder %v360_v33, 0.0 }
 0x1f0   :  { %1489 = vmatmul.mubr.msk.f32.vlgmr.msra.gmra.mrb[0].mxu1 %vm386_vm1, %v500_v32 }
 0x1f2   :  { %v419_v34 = vpop.permute.xlu1 %418  ;;  %v414_v35 = vpop.permute.xlu0 %413 }
 0x1f3   :  { %v483_v36 = vmul.f32 %v414_v35, %v2204_v52  ;;  %v484_v41 = vmul.f32 %v2199_v50, %v419_v34 }
 0x1f5   :  { %v502_v38 = vmul.f32 %v1770_v37, %v483_v36 }
 0x1f6   :  { %v364_v39 = vpop.permute.xlu0 %363  ;;  %v362_v40 = vpop.permute.xlu1 %361 }
 0x1f7   :  { %1773 = vrcp.f32 %v364_v39  ;;  %1491 = vmatprep.mubr.msk.f32.mxu1 %vm387_vm2, %v502_v38  ;;  %vm389_vm4 = vcmp.gt.f32.partialorder %v362_v40, 0.0  ;;  %vm390_vm5 = vcmp.gt.f32.partialorder %v364_v39, 0.0 }
 0x1f8   :  { %1775 = vrcp.f32 %v362_v40 }
 0x1f9   :  { %v1772_v42 = vpop.eup %1771 }
 0x1fa   :  { %v504_v43 = vmul.f32 %v1772_v42, %v484_v41  ;;  %v429_v44 = vpop.permute.xlu0 %428  ;;  %v424_v45 = vpop.permute.xlu1 %423  ;;  %v744_v41 = vld [vmem:[#allocation11 + $0x78] sm:$0xff] }
 0x1fb   :  { %v486_v48 = vmul.f32 %v2206_v53, %v429_v44  ;;  %v485_v51 = vmul.f32 %v424_v45, %v2212_v54 }
 0x1fc   :  { %1492 = vmatmul.mubr.msk.f32.gmra.mrb[2].mxu1 %vm388_vm3, %v504_v43  ;;  %v1254_v43 = vld [vmem:[%s2402_s5] ss:$0 sm:$0xff] }
 0x1fe   :  { %v368_v46 = vpop.permute.xlu0 %367  ;;  %v366_v47 = vpop.permute.xlu1 %365 }
 0x1ff   :  { %1777 = vrcp.f32 %v368_v46  ;;  %vm391_vm6 = vcmp.gt.f32.partialorder %v366_v47, 0.0  ;;  %vm392_vm7 = vcmp.gt.f32.partialorder %v368_v46, 0.0 }
 0x200   :  { %1779 = vrcp.f32 %v366_v47 }
 0x201   :  { %v1774_v49 = vpop.eup %1773 }
 0x202   :  { %v1776_v52 = vpop.eup %1775  ;;  %v508_v1 = vmul.f32 %v1774_v49, %v486_v48  ;;  %v439_v2 = vpop.permute.xlu0 %438 }
 0x203   :  { %v434_v50 = vpop.permute.xlu1 %433  ;;  %v506_v3 = vmul.f32 %v1776_v52, %v485_v51  ;;  %v488_v6 = vmul.f32 %v2214_v55, %v439_v2 }
 0x204   :  { %v487_v7 = vmul.f32 %v434_v50, %v2218_v56 }
 0x205   :  { %1494 = vmatprep.mubr.msk.f32.mxu1 %vm389_vm4, %v506_v3 }
 0x206   :  { %1495 = vmatmul.mubr.msk.f32.gmra.mrb[4].mxu1 %vm390_vm5, %v508_v1  ;;  %v372_v4 = vpop.permute.xlu0 %371 }
 0x207   :  { %v370_v5 = vpop.permute.xlu1 %369  ;;  %1781 = vrcp.f32 %v372_v4  ;;  %vm394_vm9 = vcmp.gt.f32.partialorder %v372_v4, 0.0 }
 0x208   :  { %1783 = vrcp.f32 %v370_v5  ;;  %vm393_vm8 = vcmp.gt.f32.partialorder %v370_v5, 0.0 }
 0x209   :  { %v1778_v53 = vpop.eup %1777 }
 0x20a   :  { %v1780_v8 = vpop.eup %1779  ;;  %v512_v54 = vmul.f32 %v1778_v53, %v488_v6  ;;  %v449_v9 = vpop.permute.xlu0 %448 }
 0x20b   :  { %v444_v10 = vpop.permute.xlu1 %443  ;;  %v510_v11 = vmul.f32 %v1780_v8, %v487_v7  ;;  %v490_v14 = vmul.f32 %v2220_v57, %v449_v9 }
 0x20c   :  { %v489_v15 = vmul.f32 %v444_v10, %v2226_v58 }
 0x20d   :  { %1497 = vmatprep.mubr.msk.f32.mxu1 %vm391_vm6, %v510_v11 }
 0x20e   :  { %1498 = vmatmul.mubr.msk.f32.gmra.mrb[6].mxu1 %vm392_vm7, %v512_v54  ;;  %v376_v12 = vpop.permute.xlu0 %375 }
 0x20f   :  { %v374_v13 = vpop.permute.xlu1 %373  ;;  %1785 = vrcp.f32 %v376_v12  ;;  %vm396_vm11 = vcmp.gt.f32.partialorder %v376_v12, 0.0 }
 0x210   :  { %1787 = vrcp.f32 %v374_v13  ;;  %vm395_vm10 = vcmp.gt.f32.partialorder %v374_v13, 0.0 }
 0x211   :  { %v1782_v55 = vpop.eup %1781 }
 0x212   :  { %v1784_v16 = vpop.eup %1783  ;;  %v516_v56 = vmul.f32 %v1782_v55, %v490_v14  ;;  %v459_v17 = vpop.permute.xlu0 %458 }
 0x213   :  { %v454_v18 = vpop.permute.xlu1 %453  ;;  %v514_v19 = vmul.f32 %v1784_v16, %v489_v15  ;;  %v492_v22 = vmul.f32 %v2228_v59, %v459_v17 }
 0x214   :  { %v491_v23 = vmul.f32 %v454_v18, %v2232_v60 }
 0x215   :  { %1500 = vmatprep.mubr.msk.f32.mxu1 %vm393_vm8, %v514_v19 }
 0x216   :  { %1501 = vmatmul.mubr.msk.f32.gmra.mrb[8].mxu1 %vm394_vm9, %v516_v56  ;;  %v380_v20 = vpop.permute.xlu0 %379 }
 0x217   :  { %v378_v21 = vpop.permute.xlu1 %377  ;;  %1789 = vrcp.f32 %v380_v20  ;;  %vm398_vm13 = vcmp.gt.f32.partialorder %v380_v20, 0.0 }
 0x218   :  { %1791 = vrcp.f32 %v378_v21  ;;  %vm397_vm12 = vcmp.gt.f32.partialorder %v378_v21, 0.0 }
 0x219   :  { %v1786_v57 = vpop.eup %1785 }
 0x21a   :  { %v1788_v24 = vpop.eup %1787  ;;  %v520_v58 = vmul.f32 %v1786_v57, %v492_v22  ;;  %v469_v25 = vpop.permute.xlu0 %468 }
 0x21b   :  { %v464_v26 = vpop.permute.xlu1 %463  ;;  %v518_v27 = vmul.f32 %v1788_v24, %v491_v23  ;;  %v494_v30 = vmul.f32 %v2234_v61, %v469_v25 }
 0x21c   :  { %v493_v31 = vmul.f32 %v464_v26, %v2240_v62  ;;  %v743_v62 = vld [vmem:[#allocation11 + $0x70] sm:$0xff] }
 0x21d   :  { %1503 = vmatprep.mubr.msk.f32.mxu1 %vm395_vm10, %v518_v27  ;;  %v1716_v42 = vpack.c.bf16 %v744_v41, %v743_v62 }
 0x21e   :  { %1504 = vmatmul.mubr.msk.f32.gmra.mrb[10].mxu1 %vm396_vm11, %v520_v58  ;;  %v384_v28 = vpop.permute.xlu0 %383 }
 0x21f   :  { %v382_v29 = vpop.permute.xlu1 %381  ;;  %1793 = vrcp.f32 %v384_v28  ;;  %vm400_vm15 = vcmp.gt.f32.partialorder %v384_v28, 0.0  ;;  %1717 = vmatprep.subr.bf16.mxu0 %v1716_v42 }
 0x220   :  { %1795 = vrcp.f32 %v382_v29  ;;  %vm399_vm14 = vcmp.gt.f32.partialorder %v382_v29, 0.0  ;;  %1719 = vmatpush3.bf16.msra.mxu0 %v1716_v42 }
 0x221   :  { %v1790_v59 = vpop.eup %1789 }
 0x222   :  { %v1792_v32 = vpop.eup %1791  ;;  %v524_v60 = vmul.f32 %v1790_v59, %v494_v30  ;;  %v479_v34 = vpop.permute.xlu0 %478 }
 0x223   :  { %v522_v33 = vmul.f32 %v1792_v32, %v493_v31  ;;  %v474_v35 = vpop.permute.xlu1 %473  ;;  %v496_v36 = vmul.f32 %v2242_v63, %v479_v34  ;;  %v890_v31 = vld [vmem:[#allocation5] sm:$0xff] }
 0x224   :  { %v495_v38 = vmul.f32 %v474_v35, %v2246_v0 }
 0x225   :  { %1506 = vmatprep.mubr.msk.f32.mxu1 %vm397_vm12, %v522_v33 }
 0x226   :  { %1507 = vmatmul.mubr.msk.f32.gmra.mrb[12].mxu1 %vm398_vm13, %v524_v60 }
 0x229   :  { %v1794_v37 = vpop.eup %1793 }
 0x22a   :  { %v1796_v39 = vpop.eup %1795  ;;  %v528_v61 = vmul.f32 %v1794_v37, %v496_v36 }
 0x22b   :  { %v526_v40 = vmul.f32 %v1796_v39, %v495_v38 }
 0x22d   :  { %1509 = vmatprep.mubr.msk.f32.mxu1 %vm399_vm14, %v526_v40 }
 0x22e   :  { %1510 = vmatmul.mubr.msk.f32.gmra.mrb[14].mxu1 %vm400_vm15, %v528_v61 }
 0x22f   :  { %1600 = vmatprep.mubr.f32.mxu1 %v890_v31 }
 0x2c3   :  { %v1490_v63 = vpop.f32.mrb[0].mxu1 }
 0x2c4   :  { %v640_v44 = vadd.f32 %v1490_v63, %v1254_v43  ;;  %v634_v45 = vpop.f32.mrb[1].mxu1 }
 0x2c5   :  { %v635_v0 = vadd.f32 %v1254_v43, %v634_v45 }
 0x2c6   :  { %v714_v47 = vmax.f32 %v640_v44, 0.0 }
 0x2c7   :  { %v713_v46 = vmax.f32 %v635_v0, 0.0 }
 0x2c9   :  { %1544 = vmatprep.mubr.f32.mxu0 %v713_v46 }
 0x2ca   :  { %1545 = vmatmul.mubr.f32.vlgmr.msra.gmra.mrb[16].mxu0 %v714_v47 }
 0x2cf   :  { %v1493_v48 = vpop.f32.mrb[2].mxu1 }
 0x2d0   :  { %v650_v49 = vadd.f32 %v1493_v48, %v1254_v43  ;;  %v644_v51 = vpop.f32.mrb[3].mxu1 }
 0x2d1   :  { %v645_v52 = vadd.f32 %v1254_v43, %v644_v51 }
 0x2d2   :  { %v716_v2 = vmax.f32 %v650_v49, 0.0 }
 0x2d3   :  { %v715_v1 = vmax.f32 %v645_v52, 0.0  ;;  %v891_v52 = vld [vmem:[#allocation5 + $0x8] sm:$0xff] }
 0x2d5   :  { %1547 = vmatprep.mubr.f32.mxu0 %v715_v1  ;;  %v892_v1 = vld [vmem:[#allocation5 + $0x10] sm:$0xff] }
 0x2d6   :  { %1548 = vmatmul.mubr.f32.gmra.mrb[18].mxu0 %v716_v2  ;;  %v893_v2 = vld [vmem:[#allocation5 + $0x18] sm:$0xff] }
 0x2d9   :  { %v1496_v50 = vpop.f32.mrb[4].mxu1 }
 0x2da   :  { %v660_v3 = vadd.f32 %v1496_v50, %v1254_v43  ;;  %v654_v4 = vpop.f32.mrb[5].mxu1  ;;  %v894_v50 = vld [vmem:[#allocation5 + $0x20] sm:$0xff] }
 0x2db   :  { %v655_v5 = vadd.f32 %v1254_v43, %v654_v4  ;;  %v896_v4 = vld [vmem:[#allocation5 + $0x30] sm:$0xff] }
 0x2dc   :  { %v718_v53 = vmax.f32 %v660_v3, 0.0  ;;  %v895_v3 = vld [vmem:[#allocation5 + $0x28] sm:$0xff] }
 0x2dd   :  { %v717_v6 = vmax.f32 %v655_v5, 0.0  ;;  %v897_v5 = vld [vmem:[#allocation5 + $0x38] sm:$0xff] }
 0x2df   :  { %1550 = vmatprep.mubr.f32.mxu0 %v717_v6  ;;  %v898_v6 = vld [vmem:[#allocation5 + $0x40] sm:$0xff] }
 0x2e0   :  { %1551 = vmatmul.mubr.f32.gmra.mrb[20].mxu0 %v718_v53  ;;  %v899_v53 = vld [vmem:[#allocation5 + $0x48] sm:$0xff] }
 0x2e1   :  { %v1499_v7 = vpop.f32.mrb[6].mxu1 }
 0x2e2   :  { %v670_v8 = vadd.f32 %v1499_v7, %v1254_v43  ;;  %v664_v54 = vpop.f32.mrb[7].mxu1  ;;  %v900_v7 = vld [vmem:[#allocation5 + $0x50] sm:$0xff] }
 0x2e3   :  { %v665_v9 = vadd.f32 %v1254_v43, %v664_v54  ;;  %v902_v54 = vld [vmem:[#allocation5 + $0x60] sm:$0xff] }
 0x2e4   :  { %v720_v11 = vmax.f32 %v670_v8, 0.0  ;;  %v901_v8 = vld [vmem:[#allocation5 + $0x58] sm:$0xff] }
 0x2e5   :  { %v719_v10 = vmax.f32 %v665_v9, 0.0  ;;  %v903_v9 = vld [vmem:[#allocation5 + $0x68] sm:$0xff] }
 0x2e7   :  { %1553 = vmatprep.mubr.f32.mxu0 %v719_v10  ;;  %v904_v10 = vld [vmem:[#allocation5 + $0x70] sm:$0xff] }
 0x2e8   :  { %1554 = vmatmul.mubr.f32.gmra.mrb[22].mxu0 %v720_v11  ;;  %v905_v11 = vld [vmem:[#allocation5 + $0x78] sm:$0xff] }
 0x2e9   :  { %v1502_v12 = vpop.f32.mrb[8].mxu1 }
 0x2ea   :  { %v680_v13 = vadd.f32 %v1502_v12, %v1254_v43  ;;  %v674_v14 = vpop.f32.mrb[9].mxu1  ;;  %v1271_v12 = vld [vmem:[%s2404_s7] ss:$0 sm:$0xff]  ;;  %s2035_s7 = smov [#allocation13]  }
 0x2eb   :  { %v675_v55 = vadd.f32 %v1254_v43, %v674_v14  ;;  %s1239_s13 = sshll.u32 %s2035_s7, 4  ;;  %s1240_s13 = int_to_ptr.vmem [resolvable:$true] %s1239_s13 }
 0x2ec   :  { %v722_v16 = vmax.f32 %v680_v13, 0.0  ;;  %s1993_s14 = scalar_lea.vmem %s1240_s13, 2048  ;;  %p1998_p7 = scmp.lt.s32.totalorder %s1240_s13, %s1240_s13 }
 0x2ed   :  { %v721_v15 = vmax.f32 %v675_v55, 0.0  ;;  %p1994_p6 = scmp.ne.s32.totalorder %s1240_s13, %s1993_s14  ;;  %p1999_p8 = scmp.lt.s32.totalorder %s1993_s14, %s1993_s14 }
 0x2ef   :  { %1556 = vmatprep.mubr.f32.mxu0 %v721_v15  ;;  %p2000_p9 = por %p1999_p8, %p1998_p7 }
 0x2f0   :  { %1557 = vmatmul.mubr.f32.gmra.mrb[24].mxu0 %v722_v16 }
 0x2f1   :  { %v1505_v56 = vpop.f32.mrb[10].mxu1  ;;  %p2001_p10 = pnand %p2000_p9, %p1994_p6 }
 0x2f2   :  { %v690_v17 = vadd.f32 %v1505_v56, %v1254_v43  ;;  %v684_v18 = vpop.f32.mrb[11].mxu1 }
 0x2f3   :  { %v685_v19 = vadd.f32 %v1254_v43, %v684_v18 }
 0x2f4   :  { %v724_v21 = vmax.f32 %v690_v17, 0.0 }
 0x2f5   :  { %v723_v20 = vmax.f32 %v685_v19, 0.0 }
 0x2f7   :  { %1559 = vmatprep.mubr.f32.mxu0 %v723_v20 }
 0x2f8   :  { %1560 = vmatmul.mubr.f32.gmra.mrb[26].mxu0 %v724_v21 }
 0x2f9   :  { %v1508_v22 = vpop.f32.mrb[12].mxu1 }
 0x2fa   :  { %v700_v57 = vadd.f32 %v1508_v22, %v1254_v43  ;;  %v694_v23 = vpop.f32.mrb[13].mxu1 }
 0x2fb   :  { %v695_v24 = vadd.f32 %v1254_v43, %v694_v23 }
 0x2fc   :  { %v726_v25 = vmax.f32 %v700_v57, 0.0 }
 0x2fd   :  { %v725_v58 = vmax.f32 %v695_v24, 0.0 }
 0x2ff   :  { %1562 = vmatprep.mubr.f32.mxu0 %v725_v58 }
 0x300   :  { %1563 = vmatmul.mubr.f32.gmra.mrb[28].mxu0 %v726_v25 }
 0x301   :  { %v1511_v26 = vpop.f32.mrb[14].mxu1 }
 0x302   :  { %v710_v27 = vadd.f32 %v1511_v26, %v1254_v43  ;;  %v704_v28 = vpop.f32.mrb[15].mxu1 }
 0x303   :  { %v705_v29 = vadd.f32 %v1254_v43, %v704_v28 }
 0x304   :  { %v728_v59 = vmax.f32 %v710_v27, 0.0 }
 0x305   :  { %v727_v30 = vmax.f32 %v705_v29, 0.0 }
 0x307   :  { %1565 = vmatprep.mubr.f32.mxu0 %v727_v30 }
 0x308   :  { %1566 = vmatmul.mubr.f32.gmra.mrb[30].mxu0 %v728_v59 }
 0x39d   :  { %v1546_v32 = vpop.f32.mrb[16].mxu0 }
 0x39e   :  { %v811_v60 = vpop.f32.mrb[17].mxu0 }
 0x39f   :  { %v1720_v33 = vpack.c.bf16 %v1546_v32, %v811_v60 }
 0x3a1   :  { %1721 = vmatprep.subr.bf16.mxu1 %v1720_v33 }
 0x3a2   :  { %1723 = vmatpush3.bf16.msra.mxu1 %v1720_v33 }
 0x3a9   :  { %v1549_v34 = vpop.f32.mrb[18].mxu0 }
 0x3aa   :  { %v821_v35 = vpop.f32.mrb[19].mxu0 }
 0x3ab   :  { %v1724_v36 = vpack.c.bf16 %v1549_v34, %v821_v35 }
 0x3ad   :  { %1725 = vmatprep.subr.bf16.mxu1 %v1724_v36 }
 0x3ae   :  { %1727 = vmatpush3.bf16.msra.mxu1 %v1724_v36 }
 0x3b3   :  { %v1552_v37 = vpop.f32.mrb[20].mxu0 }
 0x3b4   :  { %v831_v38 = vpop.f32.mrb[21].mxu0 }
 0x3b5   :  { %v1728_v39 = vpack.c.bf16 %v1552_v37, %v831_v38 }
 0x3b7   :  { %1729 = vmatprep.subr.bf16.mxu1 %v1728_v39 }
 0x3b8   :  { %1731 = vmatpush3.bf16.msra.mxu1 %v1728_v39 }
 0x3bb   :  { %v1555_v61 = vpop.f32.mrb[22].mxu0 }
 0x3bc   :  { %v841_v40 = vpop.f32.mrb[23].mxu0 }
 0x3bd   :  { %v1732_v62 = vpack.c.bf16 %v1555_v61, %v841_v40 }
 0x3bf   :  { %1733 = vmatprep.subr.bf16.mxu1 %v1732_v62 }
 0x3c0   :  { %1735 = vmatpush3.bf16.msra.mxu1 %v1732_v62 }
 0x3c3   :  { %v1558_v41 = vpop.f32.mrb[24].mxu0 }
 0x3c4   :  { %v851_v42 = vpop.f32.mrb[25].mxu0 }
 0x3c5   :  { %v1736_v43 = vpack.c.bf16 %v1558_v41, %v851_v42 }
 0x3c7   :  { %1737 = vmatprep.subr.bf16.mxu1 %v1736_v43 }
 0x3c8   :  { %1739 = vmatpush3.bf16.msra.mxu1 %v1736_v43 }
 0x3cb   :  { %v1561_v63 = vpop.f32.mrb[26].mxu0 }
 0x3cc   :  { %v861_v44 = vpop.f32.mrb[27].mxu0 }
 0x3cd   :  { %v1740_v45 = vpack.c.bf16 %v1561_v63, %v861_v44 }
 0x3cf   :  { %1741 = vmatprep.subr.bf16.mxu1 %v1740_v45 }
 0x3d0   :  { %1743 = vmatpush3.bf16.msra.mxu1 %v1740_v45 }
 0x3d3   :  { %v1564_v0 = vpop.f32.mrb[28].mxu0 }
 0x3d4   :  { %v871_v46 = vpop.f32.mrb[29].mxu0 }
 0x3d5   :  { %v1744_v47 = vpack.c.bf16 %v1564_v0, %v871_v46 }
 0x3d7   :  { %1745 = vmatprep.subr.bf16.mxu1 %v1744_v47 }
 0x3d8   :  { %1747 = vmatpush3.bf16.msra.mxu1 %v1744_v47 }
 0x3db   :  { %v1567_v48 = vpop.f32.mrb[30].mxu0 }
 0x3dc   :  { %v881_v49 = vpop.f32.mrb[31].mxu0 }
 0x3dd   :  { %v1748_v51 = vpack.c.bf16 %v1567_v48, %v881_v49 }
 0x3df   :  { %1749 = vmatprep.subr.bf16.mxu1 %v1748_v51 }
 0x3e0   :  { %1751 = vmatpush3.bf16.msra.mxu1 %v1748_v51 }
 0x3e3   :  { %1601 = vmatmul.mubr.f32.vlgmr.msra.gmra.mrb[16].mxu1 %v891_v52 }
 0x3e4   :  { %1603 = vmatprep.mubr.f32.mxu1 %v892_v1 }
 0x3e7   :  { %1604 = vmatmul.mubr.f32.gmra.mrb[18].mxu1 %v893_v2 }
 0x3e8   :  { %1606 = vmatprep.mubr.f32.mxu1 %v894_v50 }
 0x3eb   :  { %1607 = vmatmul.mubr.f32.gmra.mrb[20].mxu1 %v895_v3 }
 0x3ec   :  { %1609 = vmatprep.mubr.f32.mxu1 %v896_v4 }
 0x3ef   :  { %1610 = vmatmul.mubr.f32.gmra.mrb[22].mxu1 %v897_v5 }
 0x3f0   :  { %1612 = vmatprep.mubr.f32.mxu1 %v898_v6 }
 0x3f3   :  { %1613 = vmatmul.mubr.f32.gmra.mrb[24].mxu1 %v899_v53 }
 0x3f4   :  { %1615 = vmatprep.mubr.f32.mxu1 %v900_v7 }
 0x3f7   :  { %1616 = vmatmul.mubr.f32.gmra.mrb[26].mxu1 %v901_v8 }
 0x3f8   :  { %1618 = vmatprep.mubr.f32.mxu1 %v902_v54 }
 0x3fb   :  { %1619 = vmatmul.mubr.f32.gmra.mrb[28].mxu1 %v903_v9 }
 0x3fc   :  { %1621 = vmatprep.mubr.f32.mxu1 %v904_v10 }
 0x3ff   :  { %1622 = vmatmul.mubr.f32.gmra.mrb[30].mxu1 %v905_v11 }
 0x4b6   :  { %v1602_v13 = vpop.f32.mrb[16].mxu1 }
 0x4b7   :  { %v985_v14 = vadd.f32 %v1602_v13, %v1271_v12  ;;  %v979_v55 = vpop.f32.mrb[17].mxu1 }
 0x4b8   :  { %v980_v15 = vadd.f32 %v1271_v12, %v979_v55 }
 0x4b9   :  { %1060 = vmax.xlane.f32.xlu0 %v985_v14 }
 0x4ba   :  { %v1605_v16 = vpop.f32.mrb[18].mxu1  ;;  %1058 = vmax.xlane.f32.xlu1 %v980_v15 }
 0x4bb   :  { %v995_v56 = vadd.f32 %v1605_v16, %v1271_v12  ;;  %v989_v17 = vpop.f32.mrb[19].mxu1 }
 0x4bc   :  { %v990_v18 = vadd.f32 %v1271_v12, %v989_v17 }
 0x4be   :  { %v1608_v19 = vpop.f32.mrb[20].mxu1  ;;  %1062 = vmax.xlane.f32.xlu0 %v990_v18  ;;  %1064 = vmax.xlane.f32.xlu1 %v995_v56 }
 0x4bf   :  { %v1005_v20 = vadd.f32 %v1608_v19, %v1271_v12  ;;  %v999_v21 = vpop.f32.mrb[21].mxu1 }
 0x4c0   :  { %v1000_v22 = vadd.f32 %v1271_v12, %v999_v21 }
 0x4c2   :  { %v1611_v57 = vpop.f32.mrb[22].mxu1  ;;  %1066 = vmax.xlane.f32.xlu0 %v1000_v22  ;;  %1068 = vmax.xlane.f32.xlu1 %v1005_v20 }
 0x4c3   :  { %v1015_v23 = vadd.f32 %v1611_v57, %v1271_v12  ;;  %v1009_v24 = vpop.f32.mrb[23].mxu1 }
 0x4c4   :  { %v1010_v58 = vadd.f32 %v1271_v12, %v1009_v24 }
 0x4c6   :  { %v1614_v25 = vpop.f32.mrb[24].mxu1  ;;  %1070 = vmax.xlane.f32.xlu0 %v1010_v58  ;;  %1072 = vmax.xlane.f32.xlu1 %v1015_v23 }
 0x4c7   :  { %v1025_v26 = vadd.f32 %v1614_v25, %v1271_v12  ;;  %v1019_v27 = vpop.f32.mrb[25].mxu1 }
 0x4c8   :  { %v1020_v28 = vadd.f32 %v1271_v12, %v1019_v27 }
 0x4ca   :  { %v1617_v29 = vpop.f32.mrb[26].mxu1  ;;  %1074 = vmax.xlane.f32.xlu0 %v1020_v28  ;;  %1076 = vmax.xlane.f32.xlu1 %v1025_v26 }
 0x4cb   :  { %v2294_v30 = vadd.f32 %v1617_v29, %v1271_v12  ;;  %v1029_v59 = vpop.f32.mrb[27].mxu1 }
 0x4cc   :  { %v2296_v31 = vadd.f32 %v1271_v12, %v1029_v59 }
 0x4ce   :  { %v1620_v32 = vpop.f32.mrb[28].mxu1  ;;  %1078 = vmax.xlane.f32.xlu0 %v2296_v31  ;;  %1080 = vmax.xlane.f32.xlu1 %v2294_v30 }
 0x4cf   :  { %v2300_v60 = vadd.f32 %v1620_v32, %v1271_v12  ;;  %v1039_v33 = vpop.f32.mrb[29].mxu1 }
 0x4d0   :  { %v2302_v34 = vadd.f32 %v1271_v12, %v1039_v33 }
 0x4d2   :  { %v1623_v35 = vpop.f32.mrb[30].mxu1  ;;  %1082 = vmax.xlane.f32.xlu0 %v2302_v34  ;;  %1084 = vmax.xlane.f32.xlu1 %v2300_v60 }
 0x4d3   :  { %v2306_v36 = vadd.f32 %v1623_v35, %v1271_v12  ;;  %v1049_v37 = vpop.f32.mrb[31].mxu1 }
 0x4d4   :  { %v2308_v38 = vadd.f32 %v1271_v12, %v1049_v37 }
 0x4d6   :  { %1086 = vmax.xlane.f32.xlu0 %v2308_v38  ;;  %1088 = vmax.xlane.f32.xlu1 %v2306_v36 }
 0x546   :  { %v1061_v39 = vpop.xlane.xlu0 %1060 }
 0x547   :  { %v2312_v61 = vsub.f32 %v985_v14, %v1061_v39  ;;  %v1059_v40 = vpop.xlane.xlu1 %1058 }
 0x548   :  { %v2314_v62 = vsub.f32 %v980_v15, %v1059_v40 }
 0x549   :  { %v1108_v41 = vmul.f32 1.442695, %v2312_v61 }
 0x54a   :  { %v1106_v42 = vmul.f32 1.442695, %v2314_v62 }
 0x54b   :  { %1797 = vpow2.f32 %v1108_v41  ;;  %v1063_v43 = vpop.xlane.xlu0 %1062  ;;  %v1065_v63 = vpop.xlane.xlu1 %1064 }
 0x54c   :  { %1799 = vpow2.f32 %v1106_v42  ;;  %v2318_v44 = vsub.f32 %v990_v18, %v1063_v43  ;;  %v2320_v45 = vsub.f32 %v995_v56, %v1065_v63 }
 0x54e   :  { %v1110_v0 = vmul.f32 1.442695, %v2318_v44  ;;  %v1112_v46 = vmul.f32 1.442695, %v2320_v45 }
 0x54f   :  { %v1067_v47 = vpop.xlane.xlu0 %1066  ;;  %v1069_v48 = vpop.xlane.xlu1 %1068 }
 0x550   :  { %1801 = vpow2.f32 %v1110_v0  ;;  %v2324_v49 = vsub.f32 %v1000_v22, %v1067_v47  ;;  %v2326_v51 = vsub.f32 %v1005_v20, %v1069_v48 }
 0x551   :  { %1803 = vpow2.f32 %v1112_v46 }
 0x552   :  { %v1114_v52 = vmul.f32 1.442695, %v2324_v49  ;;  %v1116_v1 = vmul.f32 1.442695, %v2326_v51 }
 0x553   :  { %v1071_v2 = vpop.xlane.xlu0 %1070  ;;  %v1073_v50 = vpop.xlane.xlu1 %1072 }
 0x554   :  { %1805 = vpow2.f32 %v1114_v52  ;;  %v2330_v3 = vsub.f32 %v1010_v58, %v1071_v2  ;;  %v2332_v4 = vsub.f32 %v1015_v23, %v1073_v50 }
 0x555   :  { %v1798_v5 = vpop.eup %1797  ;;  %1807 = vpow2.f32 %v1116_v1 }
 0x556   :  { %v1800_v6 = vpop.eup %1799  ;;  %v1118_v53 = vmul.f32 1.442695, %v2330_v3  ;;  %v1120_v7 = vmul.f32 1.442695, %v2332_v4  ;;  %1140 = vadd.xlane.f32.xlu1 %v1798_v5 }
 0x557   :  { %v1075_v8 = vpop.xlane.xlu0 %1074  ;;  %1138 = vadd.xlane.f32.xlu0 %v1800_v6  ;;  %v1077_v54 = vpop.xlane.xlu1 %1076 }
 0x558   :  { %1809 = vpow2.f32 %v1118_v53  ;;  %v2336_v9 = vsub.f32 %v1020_v28, %v1075_v8  ;;  %v2338_v10 = vsub.f32 %v1025_v26, %v1077_v54 }
 0x559   :  { %1811 = vpow2.f32 %v1120_v7 }
 0x55a   :  { %v1802_v11 = vpop.eup %1801  ;;  %v1122_v12 = vmul.f32 1.442695, %v2336_v9  ;;  %v1124_v13 = vmul.f32 1.442695, %v2338_v10 }
 0x55b   :  { %v1804_v14 = vpop.eup %1803  ;;  %v1079_v55 = vpop.xlane.xlu0 %1078  ;;  %1142 = vadd.xlane.f32.xlu0 %v1802_v11 }
 0x55c   :  { %v1081_v15 = vpop.xlane.xlu1 %1080  ;;  %1813 = vpow2.f32 %v1122_v12  ;;  %v2343_v16 = vsub.f32 %v2296_v31, %v1079_v55  ;;  %1144 = vadd.xlane.f32.xlu1 %v1804_v14 }
 0x55d   :  { %v2346_v56 = vsub.f32 %v2294_v30, %v1081_v15  ;;  %1815 = vpow2.f32 %v1124_v13 }
 0x55e   :  { %v1806_v17 = vpop.eup %1805  ;;  %v1126_v18 = vmul.f32 1.442695, %v2343_v16 }
 0x55f   :  { %v1128_v19 = vmul.f32 1.442695, %v2346_v56  ;;  %v1808_v20 = vpop.eup %1807  ;;  %v1083_v21 = vpop.xlane.xlu0 %1082  ;;  %1146 = vadd.xlane.f32.xlu0 %v1806_v17 }
 0x560   :  { %v1085_v22 = vpop.xlane.xlu1 %1084  ;;  %1817 = vpow2.f32 %v1126_v18  ;;  %v2351_v57 = vsub.f32 %v2302_v34, %v1083_v21  ;;  %1148 = vadd.xlane.f32.xlu1 %v1808_v20 }
 0x561   :  { %v2354_v23 = vsub.f32 %v2300_v60, %v1085_v22  ;;  %1819 = vpow2.f32 %v1128_v19 }
 0x562   :  { %v1810_v24 = vpop.eup %1809  ;;  %v1130_v58 = vmul.f32 1.442695, %v2351_v57 }
 0x563   :  { %v1132_v25 = vmul.f32 1.442695, %v2354_v23  ;;  %v1812_v26 = vpop.eup %1811  ;;  %v1087_v27 = vpop.xlane.xlu0 %1086  ;;  %1150 = vadd.xlane.f32.xlu0 %v1810_v24 }
 0x564   :  { %v1089_v28 = vpop.xlane.xlu1 %1088  ;;  %1821 = vpow2.f32 %v1130_v58  ;;  %v2359_v29 = vsub.f32 %v2308_v38, %v1087_v27  ;;  %1152 = vadd.xlane.f32.xlu1 %v1812_v26 }
 0x565   :  { %v2362_v30 = vsub.f32 %v2306_v36, %v1089_v28  ;;  %1823 = vpow2.f32 %v1132_v25 }
 0x566   :  { %v1814_v59 = vpop.eup %1813  ;;  %v1134_v31 = vmul.f32 1.442695, %v2359_v29 }
 0x567   :  { %v1136_v32 = vmul.f32 1.442695, %v2362_v30  ;;  %v1816_v60 = vpop.eup %1815  ;;  %1154 = vadd.xlane.f32.xlu0 %v1814_v59 }
 0x568   :  { %1825 = vpow2.f32 %v1134_v31  ;;  %1156 = vadd.xlane.f32.xlu1 %v1816_v60 }
 0x569   :  { %1827 = vpow2.f32 %v1136_v32 }
 0x56a   :  { %v1818_v33 = vpop.eup %1817 }
 0x56b   :  { %v1820_v34 = vpop.eup %1819  ;;  %1158 = vadd.xlane.f32.xlu0 %v1818_v33 }
 0x56c   :  { %1160 = vadd.xlane.f32.xlu1 %v1820_v34 }
 0x56e   :  { %v1822_v35 = vpop.eup %1821 }
 0x56f   :  { %v1824_v37 = vpop.eup %1823  ;;  %1162 = vadd.xlane.f32.xlu0 %v1822_v35 }
 0x570   :  { %1164 = vadd.xlane.f32.xlu1 %v1824_v37 }
 0x572   :  { %v1826_v36 = vpop.eup %1825 }
 0x573   :  { %v1828_v38 = vpop.eup %1827  ;;  %1166 = vadd.xlane.f32.xlu0 %v1826_v36 }
 0x574   :  { %1168 = vadd.xlane.f32.xlu1 %v1828_v38 }
 0x5e3   :  { %v1141_v39 = vpop.xlane.xlu1 %1140 }
 0x5e4   :  { %1829 = vlog2.f32 %v1141_v39  ;;  %v1139_v40 = vpop.xlane.xlu0 %1138 }
 0x5e5   :  { %1831 = vlog2.f32 %v1139_v40 }
 0x5e8   :  { %v1143_v41 = vpop.xlane.xlu0 %1142 }
 0x5e9   :  { %1833 = vlog2.f32 %v1143_v41  ;;  %v1145_v42 = vpop.xlane.xlu1 %1144 }
 0x5ea   :  { %1835 = vlog2.f32 %v1145_v42 }
 0x5ec   :  { %v1147_v43 = vpop.xlane.xlu0 %1146 }
 0x5ed   :  { %1837 = vlog2.f32 %v1147_v43  ;;  %v1149_v63 = vpop.xlane.xlu1 %1148 }
 0x5ee   :  { %v1830_v0 = vpop.eup %1829  ;;  %1839 = vlog2.f32 %v1149_v63 }
 0x5ef   :  { %v1832_v46 = vpop.eup %1831  ;;  %v1173_v47 = vmul.f32 0.6931472, %v1830_v0 }
 0x5f0   :  { %v1171_v48 = vmul.f32 0.6931472, %v1832_v46  ;;  %v1151_v52 = vpop.xlane.xlu0 %1150 }
 0x5f1   :  { %v1203_v1 = vsub.f32 %v2312_v61, %v1173_v47  ;;  %1841 = vlog2.f32 %v1151_v52  ;;  %v1153_v2 = vpop.xlane.xlu1 %1152 }
 0x5f2   :  { %v1202_v50 = vsub.f32 %v2314_v62, %v1171_v48  ;;  %1843 = vlog2.f32 %v1153_v2 }
 0x5f3   :  { %v1834_v5 = vpop.eup %1833  ;;  %1219 = vst [vmem:[#allocation13 + $0x8] sm:$0xff] %v1203_v1 }
 0x5f4   :  { %v1836_v6 = vpop.eup %1835  ;;  %1218 = vst [vmem:[#allocation13] sm:$0xff] %v1202_v50  ;;  %v1175_v53 = vmul.f32 0.6931472, %v1834_v5  ;;  %v1155_v7 = vpop.xlane.xlu0 %1154 }
 0x5f5   :  { %v1177_v8 = vmul.f32 0.6931472, %v1836_v6  ;;  %1845 = vlog2.f32 %v1155_v7  ;;  %v1157_v54 = vpop.xlane.xlu1 %1156 }
 0x5f6   :  { %v1204_v11 = vsub.f32 %v2318_v44, %v1175_v53  ;;  %1847 = vlog2.f32 %v1157_v54 }
 0x5f7   :  { %v1838_v12 = vpop.eup %1837  ;;  %v1205_v61 = vsub.f32 %v2320_v45, %v1177_v8 }
 0x5f8   :  { %v1840_v13 = vpop.eup %1839  ;;  %1220 = vst [vmem:[#allocation13 + $0x10] sm:$0xff] %v1204_v11  ;;  %v1179_v14 = vmul.f32 0.6931472, %v1838_v12  ;;  %v1159_v62 = vpop.xlane.xlu0 %1158 }
 0x5f9   :  { %1221 = vst [vmem:[#allocation13 + $0x18] sm:$0xff] %v1205_v61  ;;  %v1181_v55 = vmul.f32 0.6931472, %v1840_v13  ;;  %1849 = vlog2.f32 %v1159_v62  ;;  %v1161_v15 = vpop.xlane.xlu1 %1160 }
 0x5fa   :  { %v1206_v17 = vsub.f32 %v2324_v49, %v1179_v14  ;;  %1851 = vlog2.f32 %v1161_v15 }
 0x5fb   :  { %v1842_v18 = vpop.eup %1841  ;;  %v1207_v19 = vsub.f32 %v2326_v51, %v1181_v55 }
 0x5fc   :  { %v1844_v20 = vpop.eup %1843  ;;  %1222 = vst [vmem:[#allocation13 + $0x20] sm:$0xff] %v1206_v17  ;;  %v1183_v44 = vmul.f32 0.6931472, %v1842_v18  ;;  %v1163_v21 = vpop.xlane.xlu0 %1162 }
 0x5fd   :  { %1223 = vst [vmem:[#allocation13 + $0x28] sm:$0xff] %v1207_v19  ;;  %v1185_v45 = vmul.f32 0.6931472, %v1844_v20  ;;  %1853 = vlog2.f32 %v1163_v21  ;;  %v1165_v22 = vpop.xlane.xlu1 %1164 }
 0x5fe   :  { %v1208_v24 = vsub.f32 %v2330_v3, %v1183_v44  ;;  %1855 = vlog2.f32 %v1165_v22 }
 0x5ff   :  { %v1846_v58 = vpop.eup %1845  ;;  %v1209_v25 = vsub.f32 %v2332_v4, %v1185_v45 }
 0x600   :  { %v1848_v26 = vpop.eup %1847  ;;  %1224 = vst [vmem:[#allocation13 + $0x30] sm:$0xff] %v1208_v24  ;;  %v1187_v49 = vmul.f32 0.6931472, %v1846_v58  ;;  %v1167_v27 = vpop.xlane.xlu0 %1166 }
 0x601   :  { %1225 = vst [vmem:[#allocation13 + $0x38] sm:$0xff] %v1209_v25  ;;  %v1189_v51 = vmul.f32 0.6931472, %v1848_v26  ;;  %1857 = vlog2.f32 %v1167_v27  ;;  %v1169_v28 = vpop.xlane.xlu1 %1168 }
 0x602   :  { %v1210_v59 = vsub.f32 %v2336_v9, %v1187_v49  ;;  %1859 = vlog2.f32 %v1169_v28 }
 0x603   :  { %v1850_v31 = vpop.eup %1849  ;;  %v1211_v32 = vsub.f32 %v2338_v10, %v1189_v51 }
 0x604   :  { %v1852_v60 = vpop.eup %1851  ;;  %1226 = vst [vmem:[#allocation13 + $0x40] sm:$0xff] %v1210_v59  ;;  %v1191_v3 = vmul.f32 0.6931472, %v1850_v31 }
 0x605   :  { %1227 = vst [vmem:[#allocation13 + $0x48] sm:$0xff] %v1211_v32  ;;  %v1193_v33 = vmul.f32 0.6931472, %v1852_v60 }
 0x606   :  { %v1212_v4 = vsub.f32 %v2343_v16, %v1191_v3 }
 0x607   :  { %v1854_v34 = vpop.eup %1853  ;;  %v1213_v35 = vsub.f32 %v2346_v56, %v1193_v33 }
 0x608   :  { %v1856_v37 = vpop.eup %1855  ;;  %1228 = vst [vmem:[#allocation13 + $0x50] sm:$0xff] %v1212_v4  ;;  %v1195_v36 = vmul.f32 0.6931472, %v1854_v34 }
 0x609   :  { %1229 = vst [vmem:[#allocation13 + $0x58] sm:$0xff] %v1213_v35  ;;  %v1197_v38 = vmul.f32 0.6931472, %v1856_v37 }
 0x60a   :  { %v1214_v9 = vsub.f32 %v2351_v57, %v1195_v36 }
 0x60b   :  { %v1858_v39 = vpop.eup %1857  ;;  %v1215_v10 = vsub.f32 %v2354_v23, %v1197_v38 }
 0x60c   :  { %v1860_v40 = vpop.eup %1859  ;;  %1230 = vst [vmem:[#allocation13 + $0x60] sm:$0xff] %v1214_v9  ;;  %v1199_v41 = vmul.f32 0.6931472, %v1858_v39 }
 0x60d   :  { %1231 = vst [vmem:[#allocation13 + $0x68] sm:$0xff] %v1215_v10  ;;  %v1201_v16 = vmul.f32 0.6931472, %v1860_v40 }
 0x60e   :  { %v1216_v42 = vsub.f32 %v2359_v29, %v1199_v41 }
 0x60f   :  { %v1217_v56 = vsub.f32 %v2362_v30, %v1201_v16 }
 0x610   :  { %1232 = vst [vmem:[#allocation13 + $0x70] sm:$0xff] %v1216_v42 }
 0x611   :  { %1233 = vst [vmem:[#allocation13 + $0x78] sm:$0xff] %v1217_v56 }
 0x612   :  { %2004 = shalt.err (!%p2001_p10)
}
 0x613   :  { %s2005_s19 = scalar_lea.hbm %s2405_s8, 2048 }
 0x614   :  { %p2006_p11 = scmp.ne.s32.totalorder %s2405_s8, %s2005_s19  ;;  %p2009_p12 = scmp.lt.u32.totalorder %s2005_s19, %s2405_s8 }
 0x616   :  { %p2011_p13 = pnand %p2009_p12, %p2006_p11 }
 0x618   :  { %2014 = shalt.err (!%p2011_p13)
}
 0x619   :  { %1245 = dma.vmem_to_hbm [thread:$0]  %s1240_s13, 2048, %s2405_s8, [#allocation4], %s2027_s17, %s2027_s17, %s2028_s18  }
 0x61a   :  { %2023 = dma.done.wait [#allocation4], 2048  }
 0x61b   :  { %2024 = vsyncadd [#allocation4], 4294965248 }
 0x61c   :  { %1249 = vsyncpa [#allocation3], 1 }
 0x61d   :  { %1250 = vsyncpa [#allocation6], 1 }
 0x61e   :  { %1251 = vsyncpa [#allocation9], 1 }
 0x61f   :  { %1252 = vsyncpa [#allocation12], 1 }
 0x620   :  { %1253 = vsyncpa [#allocation4], 1 }

</bundles_post_ra>
